<compile_context>
chip_gen: v7x
topology: tpu7x:2x2x1
jax: 0.10.0
libtpu: 0.0.40
codegen_flags: <defaults>
</compile_context>

<pallas_src>
import jax
import jax.numpy as jnp
from jax.experimental import pallas as pl
from jax.experimental.pallas import tpu as pltpu


def _round_up(x, m):
    return (x + m - 1) // m * m


def _unpool_kernel(inv_ref, sf_ref, pp_ref, ws_ref, b_ref, o_ref):
    """out_tile = parent_tile @ Ws + onehot(inverse_tile) @ point_proj + bs."""
    # Skip-connection projection on the MXU, f32 accumulation.
    acc = jnp.dot(sf_ref[...], ws_ref[...], preferred_element_type=jnp.float32)

    # In-kernel gather of the VMEM-resident point projection via one-hot MXU
    # matmul (exact: exactly one 1.0 per row).  Garbage indices in the masked
    # partial last block produce all-zero rows, which are never stored.
    tile_m = inv_ref.shape[0]
    n_point = pp_ref.shape[0]
    idx = inv_ref[...]                                            # (tile_m, 1)
    iota = jax.lax.broadcasted_iota(jnp.int32, (tile_m, n_point), 1)
    onehot = (idx == iota).astype(pp_ref.dtype)                   # (tile_m, N_point)
    acc = acc + jnp.dot(onehot, pp_ref[...],
                        preferred_element_type=jnp.float32)

    acc = acc + b_ref[...].astype(jnp.float32)
    o_ref[...] = acc.astype(o_ref.dtype)


def serialized_unpooling_pallas(point_feat, parent_feat, inverse,
                                wp, bp, ws, bs, *, tile_m=None):
    """point_feat: (N_point, Cin); parent_feat: (N_parent, Cskip);
    inverse: (N_parent,) int indices into point rows;
    wp: (Cin, Cout), ws: (Cskip, Cout), bp/bs: (Cout,)."""
    n_point, c_in = point_feat.shape
    n_parent, c_skip = parent_feat.shape
    c_out = wp.shape[1]
    assert wp.shape == (c_in, c_out) and ws.shape == (c_skip, c_out)
    assert inverse.shape == (n_parent,)

    # Project point FIRST (only N_point rows -> negligible HBM traffic vs the
    # N_parent streams), fold in bp.  Result stays VMEM-resident in the kernel.
    pp = (jnp.dot(point_feat, wp, preferred_element_type=jnp.float32)
          + bp).astype(parent_feat.dtype)

    inv2d = inverse.astype(jnp.int32).reshape(n_parent, 1)
    bias = bs.reshape(1, c_out)

    if tile_m is None:
        # Big tiles amortize per-step overhead (~0.35us); cap so the single
        # "parallel" grid axis still has >= 2 tiles for v7x's 2 TensorCores.
        tile_m = min(512, max(8, _round_up(-(-n_parent // 2), 8)))
    grid_m = pl.cdiv(n_parent, tile_m)

    # Advisory cost hint for XLA scheduling around the custom call.
    itemsize = jnp.dtype(parent_feat.dtype).itemsize
    flops = 2 * n_parent * (c_skip + n_point) * c_out
    bytes_accessed = (n_parent * c_skip * itemsize          # parent feats
                      + n_parent * 4                        # inverse
                      + n_point * c_out * itemsize          # point projection
                      + c_skip * c_out * jnp.dtype(ws.dtype).itemsize
                      + c_out * jnp.dtype(bs.dtype).itemsize
                      + n_parent * c_out * itemsize)        # output

    # NOTE: if C_out is a multiple of 128 (typical real configs) the output
    # store is lane-dense automatically; we deliberately do NOT pad C_out here
    # since trimming lanes afterwards would cost a full extra HBM pass.
    # NOTE: feeding bf16 activations/weights from the producer halves HBM
    # bytes on this mem-bound kernel; the kernel accumulates in f32 either way.
    out = pl.pallas_call(
        _unpool_kernel,
        out_shape=jax.ShapeDtypeStruct((n_parent, c_out), parent_feat.dtype),
        grid_spec=pl.GridSpec(
            grid=(grid_m,),
            in_specs=[
                pl.BlockSpec((tile_m, 1), lambda i: (i, 0)),       # inverse tile
                pl.BlockSpec((tile_m, c_skip), lambda i: (i, 0)),  # parent tile
                # Constant index_maps -> fetched once, VMEM-resident:
                pl.BlockSpec((n_point, c_out), lambda i: (0, 0)),  # point proj
                pl.BlockSpec((c_skip, c_out), lambda i: (0, 0)),   # Ws
                pl.BlockSpec((1, c_out), lambda i: (0, 0)),        # bias
            ],
            out_specs=pl.BlockSpec((tile_m, c_out), lambda i: (i, 0)),
        ),
        compiler_params=pltpu.CompilerParams(
            dimension_semantics=("parallel",),
        ),
        cost_estimate=pl.CostEstimate(flops=flops, transcendentals=0,
                                      bytes_accessed=bytes_accessed),
    )(inv2d, parent_feat, pp, ws, bias)

    return out


class SerializedUnpoolingPallas:
    """JAX/Pallas port of point_mamba.SerializedUnpooling.

    Weights are stored as (in, out) (transposed vs nn.Linear's (out, in)).
    norm_layer / act_layer default to None in the reference, so the forward is
    exactly: proj(point), proj_skip(parent), parent + point[inverse].
    """

    def __init__(self, in_channels, skip_channels, out_channels, key,
                 norm_layer=None, act_layer=None, traceable=False):
        if norm_layer is not None or act_layer is not None:
            # TODO(synk): reference defaults are None; a norm/act epilogue could
            # be fused into _unpool_kernel but is not required by the spec.
            raise NotImplementedError("norm_layer / act_layer not supported")
        self.traceable = traceable
        kp_w, kp_b, ks_w, ks_b = jax.random.split(key, 4)
        # nn.Linear default init: U(-1/sqrt(fan_in), 1/sqrt(fan_in))
        lim_p = 1.0 / float(in_channels) ** 0.5
        lim_s = 1.0 / float(skip_channels) ** 0.5
        self.wp = jax.random.uniform(kp_w, (in_channels, out_channels),
                                     jnp.float32, -lim_p, lim_p)
        self.bp = jax.random.uniform(kp_b, (out_channels,),
                                     jnp.float32, -lim_p, lim_p)
        self.ws = jax.random.uniform(ks_w, (skip_channels, out_channels),
                                     jnp.float32, -lim_s, lim_s)
        self.bs = jax.random.uniform(ks_b, (out_channels,),
                                     jnp.float32, -lim_s, lim_s)

    def __call__(self, point_feat, parent_feat, inverse):
        out = serialized_unpooling_pallas(
            point_feat, parent_feat, inverse,
            self.wp, self.bp, self.ws, self.bs)
        # TODO(synk): traceable=True also stashes the projected `point` under
        # parent['unpooling_parent']; that Point-dict bookkeeping is host-side
        # Python and not part of the kernel.
        return out


if __name__ == "__main__":
    key = jax.random.PRNGKey(0)
    k_mod, k_pf, k_sf, k_inv = jax.random.split(key, 4)

    in_channels, skip_channels, out_channels = 64, 32, 48
    n_point, n_parent = 128, 512

    point_feat = jax.random.normal(k_pf, (n_point, in_channels), jnp.float32)
    parent_feat = jax.random.normal(k_sf, (n_parent, skip_channels), jnp.float32)
    inverse = jax.random.randint(k_inv, (n_parent,), 0, n_point, jnp.int32)

    mod = SerializedUnpoolingPallas(in_channels, skip_channels, out_channels,
                                    k_mod)
    out = jax.block_until_ready(mod(point_feat, parent_feat, inverse))
    assert out.shape == (n_parent, out_channels)

    # Pure-JAX reference of the module semantics (proj, proj_skip, gather-add).
    point_proj = jnp.dot(point_feat, mod.wp,
                         precision=jax.lax.Precision.HIGHEST) + mod.bp
    parent_proj = jnp.dot(parent_feat, mod.ws,
                          precision=jax.lax.Precision.HIGHEST) + mod.bs
    ref = parent_proj + point_proj[inverse]
    assert jnp.allclose(out, ref, atol=2e-2, rtol=2e-2), \
        float(jnp.max(jnp.abs(out - ref)))

    print("KERNEL_OK")
</pallas_src>

<mosaic_0001>
module attributes {stable_mosaic.version = 11 : i64} {
  func.func @_unpool_kernel(%arg0: i32, %arg1: memref<256x1xi32, #tpu.memory_space<vmem>>, %arg2: memref<256x32xf32, #tpu.memory_space<vmem>>, %arg3: memref<128x48xf32, #tpu.memory_space<vmem>>, %arg4: memref<32x48xf32, #tpu.memory_space<vmem>>, %arg5: memref<1x48xf32, #tpu.memory_space<vmem>>, %arg6: memref<256x48xf32, #tpu.memory_space<vmem>>) attributes {dimension_semantics = [#tpu.dimension_semantics<parallel>], iteration_bounds = array<i64: 2>, scalar_prefetch = 0 : i64, scratch_operands = 0 : i64, tpu.core_type = #tpu.core_type<tc>, window_params = [{transform_indices = @transform_0, window_bounds = array<i64: 256, 1>}, {transform_indices = @transform_1, window_bounds = array<i64: 256, 32>}, {pipeline_mode = #tpu.pipeline_mode<synchronous>, transform_indices = @transform_2, window_bounds = array<i64: 128, 48>}, {pipeline_mode = #tpu.pipeline_mode<synchronous>, transform_indices = @transform_3, window_bounds = array<i64: 32, 48>}, {pipeline_mode = #tpu.pipeline_mode<synchronous>, transform_indices = @transform_4, window_bounds = array<i64: 1, 48>}, {transform_indices = @transform_5, window_bounds = array<i64: 256, 48>}]} {
    %c0 = arith.constant 0 : index
    %c0_0 = arith.constant 0 : index
    %0 = vector.load %arg2[%c0, %c0_0] : memref<256x32xf32, #tpu.memory_space<vmem>>, vector<256x32xf32>
    %c0_1 = arith.constant 0 : index
    %c0_2 = arith.constant 0 : index
    %1 = vector.load %arg4[%c0_1, %c0_2] : memref<32x48xf32, #tpu.memory_space<vmem>>, vector<32x48xf32>
    %cst = arith.constant dense<0.000000e+00> : vector<256x48xf32>
    %2 = tpu.matmul %0, %1, %cst {dimension_numbers = #tpu.dot_dimension_numbers<[1], [0], [0], [1], [0, 0, 1, 1], [], []>} : vector<256x32xf32>, vector<32x48xf32>, vector<256x48xf32> -> vector<256x48xf32>
    %c0_3 = arith.constant 0 : index
    %c0_4 = arith.constant 0 : index
    %3 = vector.load %arg1[%c0_3, %c0_4] : memref<256x1xi32, #tpu.memory_space<vmem>>, vector<256x1xi32>
    %4 = tpu.iota {dimensions = array<i32: 1>} : vector<256x128xi32>
    %5 = vector.broadcast %3 : vector<256x1xi32> to vector<256x128xi32>
    %6 = arith.cmpi eq, %5, %4 : vector<256x128xi32>
    %7 = arith.extui %6 : vector<256x128xi1> to vector<256x128xi32>
    %8 = arith.sitofp %7 : vector<256x128xi32> to vector<256x128xf32>
    %c0_5 = arith.constant 0 : index
    %c0_6 = arith.constant 0 : index
    %9 = vector.load %arg3[%c0_5, %c0_6] : memref<128x48xf32, #tpu.memory_space<vmem>>, vector<128x48xf32>
    %cst_7 = arith.constant dense<0.000000e+00> : vector<256x48xf32>
    %10 = tpu.matmul %8, %9, %cst_7 {dimension_numbers = #tpu.dot_dimension_numbers<[1], [0], [0], [1], [0, 0, 1, 1], [], []>} : vector<256x128xf32>, vector<128x48xf32>, vector<256x48xf32> -> vector<256x48xf32>
    %11 = arith.addf %2, %10 : vector<256x48xf32>
    %c0_8 = arith.constant 0 : index
    %c0_9 = arith.constant 0 : index
    %12 = vector.load %arg5[%c0_8, %c0_9] : memref<1x48xf32, #tpu.memory_space<vmem>>, vector<1x48xf32>
    %13 = vector.broadcast %12 : vector<1x48xf32> to vector<256x48xf32>
    %14 = arith.addf %11, %13 : vector<256x48xf32>
    %c0_10 = arith.constant 0 : index
    %c0_11 = arith.constant 0 : index
    %15 = vector.load %arg6[%c0_10, %c0_11] : memref<256x48xf32, #tpu.memory_space<vmem>>, vector<256x48xf32>
    tpu.vector_store %arg6[%c0_10, %c0_11], %14 {strides = array<i32>} : memref<256x48xf32, #tpu.memory_space<vmem>>, vector<256x48xf32>,
    return
  }
  func.func @transform_0(%arg0: i32) -> (i32, i32) {
    %c0_i32 = arith.constant 0 : i32
    %c0_i32_0 = arith.constant 0 : i32
    return %arg0, %c0_i32 : i32, i32
  }
  func.func @transform_1(%arg0: i32) -> (i32, i32) {
    %c0_i32 = arith.constant 0 : i32
    %c0_i32_0 = arith.constant 0 : i32
    return %arg0, %c0_i32 : i32, i32
  }
  func.func @transform_2(%arg0: i32) -> (i32, i32) {
    %c0_i32 = arith.constant 0 : i32
    %c0_i32_0 = arith.constant 0 : i32
    %c0_i32_1 = arith.constant 0 : i32
    return %c0_i32, %c0_i32_0 : i32, i32
  }
  func.func @transform_3(%arg0: i32) -> (i32, i32) {
    %c0_i32 = arith.constant 0 : i32
    %c0_i32_0 = arith.constant 0 : i32
    %c0_i32_1 = arith.constant 0 : i32
    return %c0_i32, %c0_i32_0 : i32, i32
  }
  func.func @transform_4(%arg0: i32) -> (i32, i32) {
    %c0_i32 = arith.constant 0 : i32
    %c0_i32_0 = arith.constant 0 : i32
    %c0_i32_1 = arith.constant 0 : i32
    return %c0_i32, %c0_i32_0 : i32, i32
  }
  func.func @transform_5(%arg0: i32) -> (i32, i32) {
    %c0_i32 = arith.constant 0 : i32
    %c0_i32_0 = arith.constant 0 : i32
    return %arg0, %c0_i32 : i32, i32
  }
}

</mosaic_0001>

<bundles_post_ra>
// kernel: tpu_custom_call.1
= control target key start
LH: loop header
LB: loop body
LE: loop exit
PB: predicated region body
PF: predicated region fallthrough
CT: control target
= control target key end

     0   :  { %s1669_s18 = smov 0   ;;  %s2089_s0 = inlined_call_operand.vmem [shape: s32[512,1], index: 0, kind: input, shape index: {}]   ;;  %s2090_s1 = inlined_call_operand.vmem [shape: f32[512,32], index: 1, kind: input, shape index: {}]   ;;  %s2091_s2 = inlined_call_operand.vmem [shape: f32[128,48], index: 2, kind: input, shape index: {}]   ;;  %s2092_s3 = inlined_call_operand.vmem [shape: f32[32,48], index: 3, kind: input, shape index: {}]   ;;  %s2093_s4 = inlined_call_operand.vmem [shape: f32[1,48], index: 4, kind: input, shape index: {}]   ;;  %s2094_s5 = inlined_call_operand.vmem [shape: f32[512,48], index: 5, kind: output, shape index: {}]  }
   0x1 LB: > { %s1215_s19 = sadd.s32 4294967295, %s1635_s18   ;;  %p1219_p0 = scmp.ge.s32.totalorder %s1635_s18, 1  ;;  %s1635_s18 = sphi %s1669_s18, %s15_s18  }
   0x2   : > { %p199_p1 = scmp.lt.s32.totalorder %s1635_s18, 3 }
   0x4   : > { %p200_p2 = pnand %p1219_p0, %p199_p1 }
   0x5   : > { %s1220_s20 = sshll.u32 (!%p200_p2), %s1215_s19, 5  ;;  %v512_v0 = vld [vmem:[%s2091_s2] sm:$0xff] (!%p200_p2)  ;;  %v513_v1 = vld [vmem:[%s2091_s2 + $0x8] sm:$0xff] (!%p200_p2)  ;;  %v514_v2 = vld [vmem:[%s2091_s2 + $0x10] sm:$0xff] (!%p200_p2)  ;;  %v1637_v3 = vmov (!%p200_p2), 0   ;;  %vm753_vm0 = vcmask (!%p200_p2), 261120  }
   0x6   : > { %203 = sbr.rel (%p200_p2) target bundleno = 428 (0x1ac), region = 40  ;;  %1628 = vset.pattern.permute.xlu1 (!%p200_p2), %v1637_v3  ;;  %1627 = vset.pattern.permute.xlu0 (!%p200_p2), %v1637_v3  ;;  %p233_p3 = scmp.lt.s32.totalorder (!%p200_p2), %s1220_s20, 63  ;;  %v1545_v4 = vpack.c.bf16 (!%p200_p2), %v513_v1, %v512_v0  ;;  %v515_v5 = vld [vmem:[%s2091_s2 + $0x18] sm:$0xff] (!%p200_p2)  ;;  %v516_v7 = vld [vmem:[%s2091_s2 + $0x20] sm:$0xff] (!%p200_p2)  ;;  %v517_v8 = vld [vmem:[%s2091_s2 + $0x28] sm:$0xff] (!%p200_p2) }
   0x7   : > { %v1549_v6 = vpack.c.bf16 (!%p200_p2), %v515_v5, %v514_v2  ;;  %v282_v9 = vld [vmem:[%s2092_s3] sm:$0xff] (!%p200_p2)  ;;  %v283_v10 = vld [vmem:[%s2092_s3 + $0x8] sm:$0xff] (!%p200_p2)  ;;  %v284_v12 = vld [vmem:[%s2092_s3 + $0x10] sm:$0xff] (!%p200_p2)  ;;  %v1553_v14 = vpack.c.bf16 (!%p200_p2), %v517_v8, %v516_v7 }
   0x8   : > { %1546 = vmatprep.subr.bf16.mxu1 (!%p200_p2), %v1545_v4  ;;  %v1577_v11 = vpack.c.bf16 (!%p200_p2), %v283_v10, %v282_v9  ;;  %v285_v13 = vld [vmem:[%s2092_s3 + $0x18] sm:$0xff] (!%p200_p2)  ;;  %v518_v15 = vld [vmem:[%s2091_s2 + $0x30] sm:$0xff] (!%p200_p2)  ;;  %v520_v23 = vld [vmem:[%s2091_s2 + $0x40] sm:$0xff] (!%p200_p2) }
   0x9   : > { %1548 = vmatpush3.bf16.msra.mxu1 (!%p200_p2), %v1545_v4  ;;  %v1581_v16 = vpack.c.bf16 (!%p200_p2), %v285_v13, %v284_v12  ;;  %v519_v19 = vld [vmem:[%s2091_s2 + $0x38] sm:$0xff] (!%p200_p2)  ;;  %v521_v24 = vld [vmem:[%s2091_s2 + $0x48] sm:$0xff] (!%p200_p2)  ;;  %v522_v28 = vld [vmem:[%s2091_s2 + $0x50] sm:$0xff] (!%p200_p2) }
   0xa   : > { %1550 = vmatprep.subr.bf16.mxu1 (!%p200_p2), %v1549_v6  ;;  %1578 = vmatprep.subr.bf16.mxu0 (!%p200_p2), %v1577_v11  ;;  %v1557_v22 = vpack.c.bf16 (!%p200_p2), %v519_v19, %v518_v15  ;;  %v1561_v27 = vpack.c.bf16 (!%p200_p2), %v521_v24, %v520_v23  ;;  %v523_v29 = vld [vmem:[%s2091_s2 + $0x58] sm:$0xff] (!%p200_p2)  ;;  %v524_v36 = vld [vmem:[%s2091_s2 + $0x60] sm:$0xff] (!%p200_p2)  ;;  %v525_v37 = vld [vmem:[%s2091_s2 + $0x68] sm:$0xff] (!%p200_p2) }
   0xb   : > { %1580 = vmatpush3.bf16.msra.mxu0 (!%p200_p2), %v1577_v11  ;;  %v1565_v33 = vpack.c.bf16 (!%p200_p2), %v523_v29, %v522_v28  ;;  %v1569_v41 = vpack.c.bf16 (!%p200_p2), %v525_v37, %v524_v36  ;;  %v526_v43 = vld [vmem:[%s2091_s2 + $0x70] sm:$0xff] (!%p200_p2)  ;;  %v527_v44 = vld [vmem:[%s2091_s2 + $0x78] sm:$0xff] (!%p200_p2) }
   0xc   : > { %1582 = vmatprep.subr.bf16.mxu0 (!%p200_p2), %v1581_v16  ;;  %v1573_v48 = vpack.c.bf16 (!%p200_p2), %v527_v44, %v526_v43 }
   0xd   : > { %s2096_s20 = smov (!%p233_p3, %s1220_s20), 63  ;;  %1552 = vmatpush3.bf16.msra.mxu1 %v1549_v6 }
   0xe   : > { %s1701_s12 = sshll.u32 %s2096_s20, 3  ;;  %1554 = vmatprep.subr.bf16.mxu1 %v1553_v14 }
   0xf   : > { %s1713_s21 = scalar_lea.vmem %s2089_s0, %s1701_s12  ;;  %1584 = vmatpush3.bf16.msra.mxu0 %v1581_v16  ;;  %s1737_s6 = scalar_lea.vmem %s2090_s1, %s1701_s12 }
  0x10   : > { %v288_v17 = vld [vmem:[%s1713_s21 + $0x10] sm:$0xff]  ;;  %v286_v18 = vld [vmem:[%s1713_s21] sm:$0xff]  ;;  %v289_v20 = vld [vmem:[%s1713_s21 + $0x18] sm:$0xff]  ;;  %s1966_s25 = scalar_lea.vmem %s2094_s5, %s1701_s12 }
  0x11   : > { %327 = vperm.xlu1 %1628, %v288_v17   ;;  %321 = vperm.xlu0 %1627, %v286_v18   ;;  %v287_v21 = vld [vmem:[%s1713_s21 + $0x8] sm:$0xff]  ;;  %v290_v26 = vld [vmem:[%s1713_s21 + $0x20] sm:$0xff]  ;;  %v293_v30 = vld [vmem:[%s1713_s21 + $0x38] sm:$0xff] }
  0x12   : > { %v291_v25 = vld [vmem:[%s1713_s21 + $0x28] sm:$0xff]  ;;  %1556 = vmatpush3.bf16.msra.mxu1 %v1553_v14  ;;  %v292_v31 = vld [vmem:[%s1713_s21 + $0x30] sm:$0xff]  ;;  %v250_v32 = vld [vmem:[%s1737_s6] sm:$0xff] }
  0x13   : > { %1558 = vmatprep.subr.bf16.mxu1 %v1557_v22  ;;  %1497 = vmatprep.mubr.msk.f32.mxu0 %vm753_vm0, %v250_v32  ;;  %v251_v34 = vld [vmem:[%s1737_s6 + $0x8] sm:$0xff]  ;;  %v252_v35 = vld [vmem:[%s1737_s6 + $0x10] sm:$0xff]  ;;  %v253_v38 = vld [vmem:[%s1737_s6 + $0x18] sm:$0xff] }
  0x14   : > { %1498 = vmatmul.mubr.msk.f32.vlgmr.msra.gmra.mrb[0].mxu0 %vm753_vm0, %v251_v34  ;;  %v295_v39 = vld [vmem:[%s1713_s21 + $0x48] sm:$0xff]  ;;  %v294_v40 = vld [vmem:[%s1713_s21 + $0x40] sm:$0xff]  ;;  %v297_v46 = vld [vmem:[%s1713_s21 + $0x58] sm:$0xff] }
  0x15   : > { %330 = vperm.xlu1 %1628, %v289_v20   ;;  %324 = vperm.xlu0 %1627, %v287_v21   ;;  %v254_v42 = vld [vmem:[%s1737_s6 + $0x20] sm:$0xff]  ;;  %v255_v45 = vld [vmem:[%s1737_s6 + $0x28] sm:$0xff]  ;;  %v296_v47 = vld [vmem:[%s1713_s21 + $0x50] sm:$0xff] }
  0x16   : > { %1560 = vmatpush3.bf16.msra.mxu1 %v1557_v22  ;;  %1500 = vmatprep.mubr.msk.f32.mxu0 %vm753_vm0, %v252_v35  ;;  %v256_v49 = vld [vmem:[%s1737_s6 + $0x30] sm:$0xff]  ;;  %v257_v50 = vld [vmem:[%s1737_s6 + $0x38] sm:$0xff]  ;;  %v299_v51 = vld [vmem:[%s1713_s21 + $0x68] sm:$0xff]  ;;  %v1638_v35 = vmov 1.0  }
  0x17   : > { %1562 = vmatprep.subr.bf16.mxu1 %v1561_v27  ;;  %v298_v52 = vld [vmem:[%s1713_s21 + $0x60] sm:$0xff]  ;;  %v259_v54 = vld [vmem:[%s1737_s6 + $0x48] sm:$0xff]  ;;  %v301_v55 = vld [vmem:[%s1713_s21 + $0x78] sm:$0xff] }
  0x18   : > { %1501 = vmatmul.mubr.msk.f32.gmra.mrb[2].mxu0 %vm753_vm0, %v253_v38  ;;  %v258_v53 = vld [vmem:[%s1737_s6 + $0x40] sm:$0xff]  ;;  %v300_v56 = vld [vmem:[%s1713_s21 + $0x70] sm:$0xff]  ;;  %v261_v58 = vld [vmem:[%s1737_s6 + $0x58] sm:$0xff] }
  0x19   : > { %336 = vperm.xlu1 %1628, %v291_v25   ;;  %333 = vperm.xlu0 %1627, %v290_v26   ;;  %v260_v57 = vld [vmem:[%s1737_s6 + $0x50] sm:$0xff]  ;;  %v303_v59 = vld [vmem:[%s1713_s21 + $0x88] sm:$0xff]  ;;  %v302_v60 = vld [vmem:[%s1713_s21 + $0x80] sm:$0xff] }
  0x1a   : > { %1564 = vmatpush3.bf16.msra.mxu1 %v1561_v27  ;;  %1503 = vmatprep.mubr.msk.f32.mxu0 %vm753_vm0, %v254_v42  ;;  %v262_v61 = vld [vmem:[%s1737_s6 + $0x60] sm:$0xff]  ;;  %v263_v62 = vld [vmem:[%s1737_s6 + $0x68] sm:$0xff]  ;;  %v305_v63 = vld [vmem:[%s1713_s21 + $0x98] sm:$0xff] }
  0x1b   : > { %1566 = vmatprep.subr.bf16.mxu1 %v1565_v33  ;;  %v304_v0 = vld [vmem:[%s1713_s21 + $0x90] sm:$0xff]  ;;  %v265_v2 = vld [vmem:[%s1737_s6 + $0x78] sm:$0xff]  ;;  %v307_v3 = vld [vmem:[%s1713_s21 + $0xa8] sm:$0xff] }
  0x1c   : > { %1504 = vmatmul.mubr.msk.f32.gmra.mrb[4].mxu0 %vm753_vm0, %v255_v45  ;;  %v264_v1 = vld [vmem:[%s1737_s6 + $0x70] sm:$0xff]  ;;  %v306_v4 = vld [vmem:[%s1713_s21 + $0xa0] sm:$0xff]  ;;  %v267_v6 = vld [vmem:[%s1737_s6 + $0x88] sm:$0xff] }
  0x1d   : > { %342 = vperm.xlu1 %1628, %v293_v30   ;;  %339 = vperm.xlu0 %1627, %v292_v31   ;;  %v266_v5 = vld [vmem:[%s1737_s6 + $0x80] sm:$0xff]  ;;  %v309_v7 = vld [vmem:[%s1713_s21 + $0xb8] sm:$0xff]  ;;  %v308_v8 = vld [vmem:[%s1713_s21 + $0xb0] sm:$0xff]  ;;  %v318_v31 = vlaneseq }
  0x1e   : > { %1568 = vmatpush3.bf16.msra.mxu1 %v1565_v33  ;;  %1506 = vmatprep.mubr.msk.f32.mxu0 %vm753_vm0, %v256_v49  ;;  %v268_v9 = vld [vmem:[%s1737_s6 + $0x90] sm:$0xff]  ;;  %v269_v10 = vld [vmem:[%s1737_s6 + $0x98] sm:$0xff]  ;;  %v311_v11 = vld [vmem:[%s1713_s21 + $0xc8] sm:$0xff] }
  0x1f   : > { %1570 = vmatprep.subr.bf16.mxu1 %v1569_v41  ;;  %v310_v12 = vld [vmem:[%s1713_s21 + $0xc0] sm:$0xff]  ;;  %v271_v14 = vld [vmem:[%s1737_s6 + $0xa8] sm:$0xff]  ;;  %v313_v15 = vld [vmem:[%s1713_s21 + $0xd8] sm:$0xff]  ;;  %v1847_v32 = vand.u32 127, %v318_v31 }
  0x20   : > { %1507 = vmatmul.mubr.msk.f32.gmra.mrb[6].mxu0 %vm753_vm0, %v257_v50  ;;  %v270_v13 = vld [vmem:[%s1737_s6 + $0xa0] sm:$0xff]  ;;  %v312_v16 = vld [vmem:[%s1713_s21 + $0xd0] sm:$0xff]  ;;  %v273_v18 = vld [vmem:[%s1737_s6 + $0xb8] sm:$0xff] }
  0x21   : > { %348 = vperm.xlu1 %1628, %v295_v39   ;;  %345 = vperm.xlu0 %1627, %v294_v40   ;;  %v272_v17 = vld [vmem:[%s1737_s6 + $0xb0] sm:$0xff]  ;;  %v315_v19 = vld [vmem:[%s1713_s21 + $0xe8] sm:$0xff]  ;;  %v314_v20 = vld [vmem:[%s1713_s21 + $0xe0] sm:$0xff] }
  0x22   : > { %1572 = vmatpush3.bf16.msra.mxu1 %v1569_v41  ;;  %1509 = vmatprep.mubr.msk.f32.mxu0 %vm753_vm0, %v258_v53  ;;  %v274_v21 = vld [vmem:[%s1737_s6 + $0xc0] sm:$0xff]  ;;  %v275_v22 = vld [vmem:[%s1737_s6 + $0xc8] sm:$0xff]  ;;  %v317_v23 = vld [vmem:[%s1713_s21 + $0xf8] sm:$0xff] }
  0x23   : > { %1574 = vmatprep.subr.bf16.mxu1 %v1573_v48  ;;  %v316_v24 = vld [vmem:[%s1713_s21 + $0xf0] sm:$0xff]  ;;  %v277_v26 = vld [vmem:[%s1737_s6 + $0xd8] sm:$0xff]  ;;  %v278_v27 = vld [vmem:[%s1737_s6 + $0xe0] sm:$0xff] }
  0x24   : > { %1510 = vmatmul.mubr.msk.f32.gmra.mrb[8].mxu0 %vm753_vm0, %v259_v54  ;;  %v276_v25 = vld [vmem:[%s1737_s6 + $0xd0] sm:$0xff]  ;;  %v279_v28 = vld [vmem:[%s1737_s6 + $0xe8] sm:$0xff]  ;;  %v281_v30 = vld [vmem:[%s1737_s6 + $0xf8] sm:$0xff] }
  0x25   : > { %354 = vperm.xlu1 %1628, %v297_v46   ;;  %351 = vperm.xlu0 %1627, %v296_v47   ;;  %v280_v29 = vld [vmem:[%s1737_s6 + $0xf0] sm:$0xff] }
  0x26   : > { %1576 = vmatpush3.bf16.msra.mxu1 %v1573_v48  ;;  %1512 = vmatprep.mubr.msk.f32.mxu0 %vm753_vm0, %v260_v57 }
  0x28   : > { %1513 = vmatmul.mubr.msk.f32.gmra.mrb[10].mxu0 %vm753_vm0, %v261_v58 }
  0x29   : > { %360 = vperm.xlu1 %1628, %v299_v51   ;;  %357 = vperm.xlu0 %1627, %v298_v52  }
  0x2a   : > { %1515 = vmatprep.mubr.msk.f32.mxu0 %vm753_vm0, %v262_v61 }
  0x2c   : > { %1516 = vmatmul.mubr.msk.f32.gmra.mrb[12].mxu0 %vm753_vm0, %v263_v62 }
  0x2d   : > { %366 = vperm.xlu1 %1628, %v301_v55   ;;  %363 = vperm.xlu0 %1627, %v300_v56  }
  0x2e   : > { %1518 = vmatprep.mubr.msk.f32.mxu0 %vm753_vm0, %v264_v1 }
  0x30   : > { %1519 = vmatmul.mubr.msk.f32.gmra.mrb[14].mxu0 %vm753_vm0, %v265_v2 }
  0x31   : > { %372 = vperm.xlu1 %1628, %v303_v59   ;;  %369 = vperm.xlu0 %1627, %v302_v60  }
  0x32   : > { %1521 = vmatprep.mubr.msk.f32.mxu0 %vm753_vm0, %v266_v5 }
  0x34   : > { %1522 = vmatmul.mubr.msk.f32.gmra.mrb[16].mxu0 %vm753_vm0, %v267_v6 }
  0x35   : > { %378 = vperm.xlu1 %1628, %v305_v63   ;;  %375 = vperm.xlu0 %1627, %v304_v0  }
  0x36   : > { %1524 = vmatprep.mubr.msk.f32.mxu0 %vm753_vm0, %v268_v9 }
  0x38   : > { %1525 = vmatmul.mubr.msk.f32.gmra.mrb[18].mxu0 %vm753_vm0, %v269_v10 }
  0x39   : > { %384 = vperm.xlu1 %1628, %v307_v3   ;;  %381 = vperm.xlu0 %1627, %v306_v4  }
  0x3a   : > { %1527 = vmatprep.mubr.msk.f32.mxu0 %vm753_vm0, %v270_v13 }
  0x3c   : > { %1528 = vmatmul.mubr.msk.f32.gmra.mrb[20].mxu0 %vm753_vm0, %v271_v14 }
  0x3d   : > { %390 = vperm.xlu1 %1628, %v309_v7   ;;  %387 = vperm.xlu0 %1627, %v308_v8  }
  0x3e   : > { %1530 = vmatprep.mubr.msk.f32.mxu0 %vm753_vm0, %v272_v17 }
  0x40   : > { %1531 = vmatmul.mubr.msk.f32.gmra.mrb[22].mxu0 %vm753_vm0, %v273_v18 }
  0x41   : > { %396 = vperm.xlu1 %1628, %v311_v11   ;;  %393 = vperm.xlu0 %1627, %v310_v12  }
  0x42   : > { %1533 = vmatprep.mubr.msk.f32.mxu0 %vm753_vm0, %v274_v21 }
  0x44   : > { %1534 = vmatmul.mubr.msk.f32.gmra.mrb[24].mxu0 %vm753_vm0, %v275_v22 }
  0x45   : > { %402 = vperm.xlu1 %1628, %v313_v15   ;;  %399 = vperm.xlu0 %1627, %v312_v16  }
  0x46   : > { %1536 = vmatprep.mubr.msk.f32.mxu0 %vm753_vm0, %v276_v25 }
  0x48   : > { %1537 = vmatmul.mubr.msk.f32.gmra.mrb[26].mxu0 %vm753_vm0, %v277_v26 }
  0x49   : > { %408 = vperm.xlu1 %1628, %v315_v19   ;;  %405 = vperm.xlu0 %1627, %v314_v20  }
  0x4a   : > { %1539 = vmatprep.mubr.msk.f32.mxu0 %vm753_vm0, %v278_v27 }
  0x4c   : > { %1540 = vmatmul.mubr.msk.f32.gmra.mrb[28].mxu0 %vm753_vm0, %v279_v28 }
  0x4d   : > { %414 = vperm.xlu1 %1628, %v317_v23   ;;  %411 = vperm.xlu0 %1627, %v316_v24  }
  0x4e   : > { %1542 = vmatprep.mubr.msk.f32.mxu0 %vm753_vm0, %v280_v29 }
  0x50   : > { %1543 = vmatmul.mubr.msk.f32.gmra.mrb[30].mxu0 %vm753_vm0, %v281_v30 }
  0x90   : > { %v328_v33 = vpop.permute.xlu1 %327  ;;  %v322_v34 = vpop.permute.xlu0 %321 }
  0x91   : > { %vm416_vm1 = vcmp.eq.s32.totalorder %v322_v34, %v1847_v32  ;;  %vm418_vm2 = vcmp.eq.s32.totalorder %v328_v33, %v1847_v32 }
  0x92   : > { %1441 = vmatprep.mubr.msk.f32.mxu1 %vm416_vm1, %v1638_v35 }
  0x94   : > { %v331_v36 = vpop.permute.xlu1 %330  ;;  %v325_v37 = vpop.permute.xlu0 %324 }
  0x95   : > { %vm417_vm3 = vcmp.eq.s32.totalorder %v325_v37, %v1847_v32  ;;  %vm419_vm4 = vcmp.eq.s32.totalorder %v331_v36, %v1847_v32 }
  0x96   : > { %1442 = vmatmul.mubr.msk.f32.vlgmr.msra.gmra.mrb[0].mxu1 %vm417_vm3, %v1638_v35 }
  0x97   : > { %1444 = vmatprep.mubr.msk.f32.mxu1 %vm418_vm2, %v1638_v35 }
  0x98   : > { %v337_v38 = vpop.permute.xlu1 %336  ;;  %v334_v39 = vpop.permute.xlu0 %333 }
  0x99   : > { %vm420_vm5 = vcmp.eq.s32.totalorder %v334_v39, %v1847_v32  ;;  %vm421_vm6 = vcmp.eq.s32.totalorder %v337_v38, %v1847_v32 }
  0x9a   : > { %1445 = vmatmul.mubr.msk.f32.gmra.mrb[2].mxu1 %vm419_vm4, %v1638_v35 }
  0x9b   : > { %1447 = vmatprep.mubr.msk.f32.mxu1 %vm420_vm5, %v1638_v35 }
  0x9c   : > { %v343_v40 = vpop.permute.xlu1 %342  ;;  %v340_v41 = vpop.permute.xlu0 %339 }
  0x9d   : > { %vm422_vm7 = vcmp.eq.s32.totalorder %v340_v41, %v1847_v32  ;;  %vm423_vm8 = vcmp.eq.s32.totalorder %v343_v40, %v1847_v32 }
  0x9e   : > { %1448 = vmatmul.mubr.msk.f32.gmra.mrb[4].mxu1 %vm421_vm6, %v1638_v35 }
  0x9f   : > { %1450 = vmatprep.mubr.msk.f32.mxu1 %vm422_vm7, %v1638_v35 }
  0xa0   : > { %v349_v42 = vpop.permute.xlu1 %348  ;;  %v346_v43 = vpop.permute.xlu0 %345 }
  0xa1   : > { %vm424_vm9 = vcmp.eq.s32.totalorder %v346_v43, %v1847_v32  ;;  %vm425_vm10 = vcmp.eq.s32.totalorder %v349_v42, %v1847_v32 }
  0xa2   : > { %1451 = vmatmul.mubr.msk.f32.gmra.mrb[6].mxu1 %vm423_vm8, %v1638_v35 }
  0xa3   : > { %1453 = vmatprep.mubr.msk.f32.mxu1 %vm424_vm9, %v1638_v35 }
  0xa4   : > { %v355_v44 = vpop.permute.xlu1 %354  ;;  %v352_v45 = vpop.permute.xlu0 %351 }
  0xa5   : > { %vm426_vm11 = vcmp.eq.s32.totalorder %v352_v45, %v1847_v32  ;;  %vm427_vm12 = vcmp.eq.s32.totalorder %v355_v44, %v1847_v32 }
  0xa6   : > { %1454 = vmatmul.mubr.msk.f32.gmra.mrb[8].mxu1 %vm425_vm10, %v1638_v35 }
  0xa7   : > { %1456 = vmatprep.mubr.msk.f32.mxu1 %vm426_vm11, %v1638_v35 }
  0xa8   : > { %v361_v46 = vpop.permute.xlu1 %360  ;;  %v358_v47 = vpop.permute.xlu0 %357 }
  0xa9   : > { %vm428_vm13 = vcmp.eq.s32.totalorder %v358_v47, %v1847_v32  ;;  %vm429_vm14 = vcmp.eq.s32.totalorder %v361_v46, %v1847_v32 }
  0xaa   : > { %1457 = vmatmul.mubr.msk.f32.gmra.mrb[10].mxu1 %vm427_vm12, %v1638_v35 }
  0xab   : > { %1459 = vmatprep.mubr.msk.f32.mxu1 %vm428_vm13, %v1638_v35 }
  0xac   : > { %v367_v48 = vpop.permute.xlu1 %366  ;;  %v364_v49 = vpop.permute.xlu0 %363 }
  0xad   : > { %vm430_vm15 = vcmp.eq.s32.totalorder %v364_v49, %v1847_v32  ;;  %vm431_vm0 = vcmp.eq.s32.totalorder %v367_v48, %v1847_v32 }
  0xae   : > { %1460 = vmatmul.mubr.msk.f32.gmra.mrb[12].mxu1 %vm429_vm14, %v1638_v35 }
  0xaf   : > { %1462 = vmatprep.mubr.msk.f32.mxu1 %vm430_vm15, %v1638_v35 }
  0xb0   : > { %v373_v50 = vpop.permute.xlu1 %372  ;;  %v370_v51 = vpop.permute.xlu0 %369 }
  0xb1   : > { %vm432_vm1 = vcmp.eq.s32.totalorder %v370_v51, %v1847_v32  ;;  %vm433_vm2 = vcmp.eq.s32.totalorder %v373_v50, %v1847_v32 }
  0xb2   : > { %1463 = vmatmul.mubr.msk.f32.gmra.mrb[14].mxu1 %vm431_vm0, %v1638_v35 }
  0xb3   : > { %1465 = vmatprep.mubr.msk.f32.mxu1 %vm432_vm1, %v1638_v35  ;;  %vm1114_vm1 = vcmask 392192  }
  0xb4   : > { %v379_v52 = vpop.permute.xlu1 %378  ;;  %v376_v53 = vpop.permute.xlu0 %375 }
  0xb5   : > { %vm434_vm3 = vcmp.eq.s32.totalorder %v376_v53, %v1847_v32  ;;  %vm435_vm4 = vcmp.eq.s32.totalorder %v379_v52, %v1847_v32 }
  0xb6   : > { %1466 = vmatmul.mubr.msk.f32.gmra.mrb[16].mxu1 %vm433_vm2, %v1638_v35 }
  0xb7   : > { %1468 = vmatprep.mubr.msk.f32.mxu1 %vm434_vm3, %v1638_v35 }
  0xb8   : > { %v385_v54 = vpop.permute.xlu1 %384  ;;  %v382_v55 = vpop.permute.xlu0 %381 }
  0xb9   : > { %vm436_vm5 = vcmp.eq.s32.totalorder %v382_v55, %v1847_v32  ;;  %vm437_vm6 = vcmp.eq.s32.totalorder %v385_v54, %v1847_v32 }
  0xba   : > { %1469 = vmatmul.mubr.msk.f32.gmra.mrb[18].mxu1 %vm435_vm4, %v1638_v35 }
  0xbb   : > { %1471 = vmatprep.mubr.msk.f32.mxu1 %vm436_vm5, %v1638_v35 }
  0xbc   : > { %v391_v56 = vpop.permute.xlu1 %390  ;;  %v388_v57 = vpop.permute.xlu0 %387 }
  0xbd   : > { %vm438_vm7 = vcmp.eq.s32.totalorder %v388_v57, %v1847_v32  ;;  %vm439_vm8 = vcmp.eq.s32.totalorder %v391_v56, %v1847_v32 }
  0xbe   : > { %1472 = vmatmul.mubr.msk.f32.gmra.mrb[20].mxu1 %vm437_vm6, %v1638_v35 }
  0xbf   : > { %1474 = vmatprep.mubr.msk.f32.mxu1 %vm438_vm7, %v1638_v35 }
  0xc0   : > { %v397_v58 = vpop.permute.xlu1 %396  ;;  %v394_v59 = vpop.permute.xlu0 %393 }
  0xc1   : > { %vm440_vm9 = vcmp.eq.s32.totalorder %v394_v59, %v1847_v32  ;;  %vm441_vm10 = vcmp.eq.s32.totalorder %v397_v58, %v1847_v32 }
  0xc2   : > { %1475 = vmatmul.mubr.msk.f32.gmra.mrb[22].mxu1 %vm439_vm8, %v1638_v35 }
  0xc3   : > { %1477 = vmatprep.mubr.msk.f32.mxu1 %vm440_vm9, %v1638_v35 }
  0xc4   : > { %v403_v60 = vpop.permute.xlu1 %402  ;;  %v400_v61 = vpop.permute.xlu0 %399 }
  0xc5   : > { %vm442_vm11 = vcmp.eq.s32.totalorder %v400_v61, %v1847_v32  ;;  %vm443_vm12 = vcmp.eq.s32.totalorder %v403_v60, %v1847_v32 }
  0xc6   : > { %1478 = vmatmul.mubr.msk.f32.gmra.mrb[24].mxu1 %vm441_vm10, %v1638_v35 }
  0xc7   : > { %1480 = vmatprep.mubr.msk.f32.mxu1 %vm442_vm11, %v1638_v35 }
  0xc8   : > { %v409_v62 = vpop.permute.xlu1 %408  ;;  %v406_v63 = vpop.permute.xlu0 %405 }
  0xc9   : > { %vm444_vm13 = vcmp.eq.s32.totalorder %v406_v63, %v1847_v32  ;;  %vm445_vm14 = vcmp.eq.s32.totalorder %v409_v62, %v1847_v32 }
  0xca   : > { %1481 = vmatmul.mubr.msk.f32.gmra.mrb[26].mxu1 %vm443_vm12, %v1638_v35 }
  0xcb   : > { %1483 = vmatprep.mubr.msk.f32.mxu1 %vm444_vm13, %v1638_v35 }
  0xcc   : > { %v412_v0 = vpop.permute.xlu0 %411  ;;  %v415_v1 = vpop.permute.xlu1 %414 }
  0xcd   : > { %vm446_vm15 = vcmp.eq.s32.totalorder %v412_v0, %v1847_v32  ;;  %vm447_vm0 = vcmp.eq.s32.totalorder %v415_v1, %v1847_v32 }
  0xce   : > { %1484 = vmatmul.mubr.msk.f32.gmra.mrb[28].mxu1 %vm445_vm14, %v1638_v35 }
  0xcf   : > { %1486 = vmatprep.mubr.msk.f32.mxu1 %vm446_vm15, %v1638_v35 }
  0xd2   : > { %1487 = vmatmul.mubr.msk.f32.gmra.mrb[30].mxu1 %vm447_vm0, %v1638_v35  ;;  %v1960_v35 = vld [vmem:[%s2093_s4] ss:$0 sm:$0xff] }
  0xe7   : > { %v1499_v2 = vpop.f32.mrb[0].mxu0 }
  0xe8   : > { %v916_v3 = vpop.f32.mrb[1].mxu0 }
  0xeb   : > { %v1502_v4 = vpop.f32.mrb[2].mxu0 }
  0xec   : > { %v926_v5 = vpop.f32.mrb[3].mxu0 }
  0xef   : > { %v1505_v6 = vpop.f32.mrb[4].mxu0 }
  0xf0   : > { %v936_v7 = vpop.f32.mrb[5].mxu0 }
  0xf3   : > { %v1508_v8 = vpop.f32.mrb[6].mxu0 }
  0xf4   : > { %v946_v9 = vpop.f32.mrb[7].mxu0 }
  0xf7   : > { %v1511_v10 = vpop.f32.mrb[8].mxu0 }
  0xf8   : > { %v956_v11 = vpop.f32.mrb[9].mxu0 }
  0xfb   : > { %v1913_v12 = vpop.f32.mrb[10].mxu0 }
  0xfc   : > { %v1915_v13 = vpop.f32.mrb[11].mxu0 }
  0xff   : > { %v1917_v14 = vpop.f32.mrb[12].mxu0 }
 0x100   : > { %v1919_v15 = vpop.f32.mrb[13].mxu0 }
 0x103   : > { %v1921_v16 = vpop.f32.mrb[14].mxu0 }
 0x104   : > { %v1923_v17 = vpop.f32.mrb[15].mxu0 }
 0x107   : > { %v1925_v18 = vpop.f32.mrb[16].mxu0 }
 0x108   : > { %v1927_v19 = vpop.f32.mrb[17].mxu0 }
 0x10b   : > { %v1929_v20 = vpop.f32.mrb[18].mxu0 }
 0x10c   : > { %v1931_v21 = vpop.f32.mrb[19].mxu0 }
 0x10f   : > { %v1933_v22 = vpop.f32.mrb[20].mxu0 }
 0x110   : > { %v1935_v23 = vpop.f32.mrb[21].mxu0 }
 0x113   : > { %v1937_v24 = vpop.f32.mrb[22].mxu0 }
 0x114   : > { %v1939_v25 = vpop.f32.mrb[23].mxu0 }
 0x117   : > { %v1941_v26 = vpop.f32.mrb[24].mxu0 }
 0x118   : > { %v1943_v27 = vpop.f32.mrb[25].mxu0 }
 0x11b   : > { %v1945_v28 = vpop.f32.mrb[26].mxu0 }
 0x11c   : > { %v1947_v29 = vpop.f32.mrb[27].mxu0 }
 0x11f   : > { %v1949_v30 = vpop.f32.mrb[28].mxu0 }
 0x120   : > { %v1951_v31 = vpop.f32.mrb[29].mxu0 }
 0x123   : > { %v1953_v32 = vpop.f32.mrb[30].mxu0 }
 0x124   : > { %v1955_v33 = vpop.f32.mrb[31].mxu0 }
 0x169   : > { %v1443_v34 = vpop.f32.mrb[0].mxu1 }
 0x16a   : > { %v922_v36 = vadd.f32 %v1499_v2, %v1443_v34  ;;  %v594_v37 = vpop.f32.mrb[1].mxu1 }
 0x16b   : > { %v917_v38 = vadd.f32 %v916_v3, %v594_v37 }
 0x16c   : > { %v1083_v39 = vadd.f32 %v1960_v35, %v922_v36 }
 0x16d   : > { %v1082_v40 = vadd.f32 %v1960_v35, %v917_v38  ;;  %v1446_v41 = vpop.f32.mrb[2].mxu1 }
 0x16e   : > { %1116 = vst.msk [vmem:[%s1966_s25 + $0x8] sm:$0xff] %vm1114_vm1, %v1083_v39  ;;  %v932_v42 = vadd.f32 %v1502_v4, %v1446_v41  ;;  %v604_v43 = vpop.f32.mrb[3].mxu1 }
 0x16f   : > { %1115 = vst.msk [vmem:[%s1966_s25] sm:$0xff] %vm1114_vm1, %v1082_v40  ;;  %v927_v44 = vadd.f32 %v926_v5, %v604_v43 }
 0x170   : > { %v1085_v45 = vadd.f32 %v1960_v35, %v932_v42 }
 0x171   : > { %v1084_v46 = vadd.f32 %v1960_v35, %v927_v44  ;;  %v1449_v47 = vpop.f32.mrb[4].mxu1 }
 0x172   : > { %1118 = vst.msk [vmem:[%s1966_s25 + $0x18] sm:$0xff] %vm1114_vm1, %v1085_v45  ;;  %v942_v48 = vadd.f32 %v1505_v6, %v1449_v47  ;;  %v614_v49 = vpop.f32.mrb[5].mxu1 }
 0x173   : > { %1117 = vst.msk [vmem:[%s1966_s25 + $0x10] sm:$0xff] %vm1114_vm1, %v1084_v46  ;;  %v937_v50 = vadd.f32 %v936_v7, %v614_v49 }
 0x174   : > { %v1087_v51 = vadd.f32 %v1960_v35, %v942_v48 }
 0x175   : > { %v1086_v52 = vadd.f32 %v1960_v35, %v937_v50  ;;  %v1452_v53 = vpop.f32.mrb[6].mxu1 }
 0x176   : > { %1120 = vst.msk [vmem:[%s1966_s25 + $0x28] sm:$0xff] %vm1114_vm1, %v1087_v51  ;;  %v952_v54 = vadd.f32 %v1508_v8, %v1452_v53  ;;  %v624_v55 = vpop.f32.mrb[7].mxu1 }
 0x177   : > { %1119 = vst.msk [vmem:[%s1966_s25 + $0x20] sm:$0xff] %vm1114_vm1, %v1086_v52  ;;  %v947_v56 = vadd.f32 %v946_v9, %v624_v55 }
 0x178   : > { %v1089_v57 = vadd.f32 %v1960_v35, %v952_v54 }
 0x179   : > { %v1088_v58 = vadd.f32 %v1960_v35, %v947_v56  ;;  %v1455_v59 = vpop.f32.mrb[8].mxu1 }
 0x17a   : > { %1122 = vst.msk [vmem:[%s1966_s25 + $0x38] sm:$0xff] %vm1114_vm1, %v1089_v57  ;;  %v962_v60 = vadd.f32 %v1511_v10, %v1455_v59  ;;  %v634_v61 = vpop.f32.mrb[9].mxu1 }
 0x17b   : > { %1121 = vst.msk [vmem:[%s1966_s25 + $0x30] sm:$0xff] %vm1114_vm1, %v1088_v58  ;;  %v957_v62 = vadd.f32 %v956_v11, %v634_v61 }
 0x17c   : > { %v1091_v63 = vadd.f32 %v1960_v35, %v962_v60 }
 0x17d   : > { %v1090_v0 = vadd.f32 %v1960_v35, %v957_v62  ;;  %v1458_v1 = vpop.f32.mrb[10].mxu1 }
 0x17e   : > { %1124 = vst.msk [vmem:[%s1966_s25 + $0x48] sm:$0xff] %vm1114_vm1, %v1091_v63  ;;  %v972_v2 = vadd.f32 %v1913_v12, %v1458_v1  ;;  %v644_v3 = vpop.f32.mrb[11].mxu1 }
 0x17f   : > { %1123 = vst.msk [vmem:[%s1966_s25 + $0x40] sm:$0xff] %vm1114_vm1, %v1090_v0  ;;  %v967_v4 = vadd.f32 %v1915_v13, %v644_v3 }
 0x180   : > { %v1093_v5 = vadd.f32 %v1960_v35, %v972_v2 }
 0x181   : > { %v1092_v6 = vadd.f32 %v1960_v35, %v967_v4  ;;  %v1461_v7 = vpop.f32.mrb[12].mxu1 }
 0x182   : > { %1126 = vst.msk [vmem:[%s1966_s25 + $0x58] sm:$0xff] %vm1114_vm1, %v1093_v5  ;;  %v982_v8 = vadd.f32 %v1917_v14, %v1461_v7  ;;  %v654_v9 = vpop.f32.mrb[13].mxu1 }
 0x183   : > { %1125 = vst.msk [vmem:[%s1966_s25 + $0x50] sm:$0xff] %vm1114_vm1, %v1092_v6  ;;  %v977_v10 = vadd.f32 %v1919_v15, %v654_v9 }
 0x184   : > { %v1095_v11 = vadd.f32 %v1960_v35, %v982_v8 }
 0x185   : > { %v1094_v12 = vadd.f32 %v1960_v35, %v977_v10  ;;  %v1464_v13 = vpop.f32.mrb[14].mxu1 }
 0x186   : > { %1128 = vst.msk [vmem:[%s1966_s25 + $0x68] sm:$0xff] %vm1114_vm1, %v1095_v11  ;;  %v992_v34 = vadd.f32 %v1921_v16, %v1464_v13  ;;  %v664_v36 = vpop.f32.mrb[15].mxu1 }
 0x187   : > { %1127 = vst.msk [vmem:[%s1966_s25 + $0x60] sm:$0xff] %vm1114_vm1, %v1094_v12  ;;  %v987_v14 = vadd.f32 %v1923_v17, %v664_v36 }
 0x188   : > { %v1097_v37 = vadd.f32 %v1960_v35, %v992_v34 }
 0x189   : > { %v1096_v15 = vadd.f32 %v1960_v35, %v987_v14  ;;  %v1467_v38 = vpop.f32.mrb[16].mxu1 }
 0x18a   : > { %1130 = vst.msk [vmem:[%s1966_s25 + $0x78] sm:$0xff] %vm1114_vm1, %v1097_v37  ;;  %v1002_v39 = vadd.f32 %v1925_v18, %v1467_v38  ;;  %v674_v40 = vpop.f32.mrb[17].mxu1 }
 0x18b   : > { %1129 = vst.msk [vmem:[%s1966_s25 + $0x70] sm:$0xff] %vm1114_vm1, %v1096_v15  ;;  %v997_v16 = vadd.f32 %v1927_v19, %v674_v40 }
 0x18c   : > { %v1099_v41 = vadd.f32 %v1960_v35, %v1002_v39 }
 0x18d   : > { %v1098_v17 = vadd.f32 %v1960_v35, %v997_v16  ;;  %v1470_v42 = vpop.f32.mrb[18].mxu1 }
 0x18e   : > { %1132 = vst.msk [vmem:[%s1966_s25 + $0x88] sm:$0xff] %vm1114_vm1, %v1099_v41  ;;  %v1012_v43 = vadd.f32 %v1929_v20, %v1470_v42  ;;  %v684_v44 = vpop.f32.mrb[19].mxu1 }
 0x18f   : > { %1131 = vst.msk [vmem:[%s1966_s25 + $0x80] sm:$0xff] %vm1114_vm1, %v1098_v17  ;;  %v1007_v18 = vadd.f32 %v1931_v21, %v684_v44 }
 0x190   : > { %v1101_v45 = vadd.f32 %v1960_v35, %v1012_v43 }
 0x191   : > { %v1100_v19 = vadd.f32 %v1960_v35, %v1007_v18  ;;  %v1473_v46 = vpop.f32.mrb[20].mxu1 }
 0x192   : > { %1134 = vst.msk [vmem:[%s1966_s25 + $0x98] sm:$0xff] %vm1114_vm1, %v1101_v45  ;;  %v1022_v47 = vadd.f32 %v1933_v22, %v1473_v46  ;;  %v694_v48 = vpop.f32.mrb[21].mxu1 }
 0x193   : > { %1133 = vst.msk [vmem:[%s1966_s25 + $0x90] sm:$0xff] %vm1114_vm1, %v1100_v19  ;;  %v1017_v20 = vadd.f32 %v1935_v23, %v694_v48 }
 0x194   : > { %v1103_v49 = vadd.f32 %v1960_v35, %v1022_v47 }
 0x195   : > { %v1102_v21 = vadd.f32 %v1960_v35, %v1017_v20  ;;  %v1476_v50 = vpop.f32.mrb[22].mxu1 }
 0x196   : > { %1136 = vst.msk [vmem:[%s1966_s25 + $0xa8] sm:$0xff] %vm1114_vm1, %v1103_v49  ;;  %v1032_v51 = vadd.f32 %v1937_v24, %v1476_v50  ;;  %v704_v52 = vpop.f32.mrb[23].mxu1 }
 0x197   : > { %1135 = vst.msk [vmem:[%s1966_s25 + $0xa0] sm:$0xff] %vm1114_vm1, %v1102_v21  ;;  %v1027_v22 = vadd.f32 %v1939_v25, %v704_v52 }
 0x198   : > { %v1105_v53 = vadd.f32 %v1960_v35, %v1032_v51 }
 0x199   : > { %v1104_v23 = vadd.f32 %v1960_v35, %v1027_v22  ;;  %v1479_v54 = vpop.f32.mrb[24].mxu1 }
 0x19a   : > { %1138 = vst.msk [vmem:[%s1966_s25 + $0xb8] sm:$0xff] %vm1114_vm1, %v1105_v53  ;;  %v1042_v55 = vadd.f32 %v1941_v26, %v1479_v54  ;;  %v714_v56 = vpop.f32.mrb[25].mxu1 }
 0x19b   : > { %1137 = vst.msk [vmem:[%s1966_s25 + $0xb0] sm:$0xff] %vm1114_vm1, %v1104_v23  ;;  %v1037_v24 = vadd.f32 %v1943_v27, %v714_v56 }
 0x19c   : > { %v1107_v57 = vadd.f32 %v1960_v35, %v1042_v55 }
 0x19d   : > { %v1106_v25 = vadd.f32 %v1960_v35, %v1037_v24  ;;  %v1482_v58 = vpop.f32.mrb[26].mxu1 }
 0x19e   : > { %1140 = vst.msk [vmem:[%s1966_s25 + $0xc8] sm:$0xff] %vm1114_vm1, %v1107_v57  ;;  %v1052_v59 = vadd.f32 %v1945_v28, %v1482_v58  ;;  %v724_v60 = vpop.f32.mrb[27].mxu1 }
 0x19f   : > { %1139 = vst.msk [vmem:[%s1966_s25 + $0xc0] sm:$0xff] %vm1114_vm1, %v1106_v25  ;;  %v1047_v26 = vadd.f32 %v1947_v29, %v724_v60 }
 0x1a0   : > { %v1109_v61 = vadd.f32 %v1960_v35, %v1052_v59 }
 0x1a1   : > { %v1108_v27 = vadd.f32 %v1960_v35, %v1047_v26  ;;  %v1485_v62 = vpop.f32.mrb[28].mxu1 }
 0x1a2   : > { %1142 = vst.msk [vmem:[%s1966_s25 + $0xd8] sm:$0xff] %vm1114_vm1, %v1109_v61  ;;  %v1062_v63 = vadd.f32 %v1949_v30, %v1485_v62  ;;  %v734_v0 = vpop.f32.mrb[29].mxu1 }
 0x1a3   : > { %1141 = vst.msk [vmem:[%s1966_s25 + $0xd0] sm:$0xff] %vm1114_vm1, %v1108_v27  ;;  %v1057_v28 = vadd.f32 %v1951_v31, %v734_v0 }
 0x1a4   : > { %v1111_v1 = vadd.f32 %v1960_v35, %v1062_v63 }
 0x1a5   : > { %v1110_v29 = vadd.f32 %v1960_v35, %v1057_v28  ;;  %v1488_v2 = vpop.f32.mrb[30].mxu1 }
 0x1a6   : > { %1144 = vst.msk [vmem:[%s1966_s25 + $0xe8] sm:$0xff] %vm1114_vm1, %v1111_v1  ;;  %v1072_v3 = vadd.f32 %v1953_v32, %v1488_v2  ;;  %v744_v4 = vpop.f32.mrb[31].mxu1 }
 0x1a7   : > { %1143 = vst.msk [vmem:[%s1966_s25 + $0xe0] sm:$0xff] %vm1114_vm1, %v1110_v29  ;;  %v1067_v5 = vadd.f32 %v1955_v33, %v744_v4 }
 0x1a8   : > { %v1113_v30 = vadd.f32 %v1960_v35, %v1072_v3 }
 0x1a9   : > { %v1112_v6 = vadd.f32 %v1960_v35, %v1067_v5 }
 0x1aa   : > { %1146 = vst.msk [vmem:[%s1966_s25 + $0xf8] sm:$0xff] %vm1114_vm1, %v1113_v30 }
 0x1ab   : > { %1145 = vst.msk [vmem:[%s1966_s25 + $0xf0] sm:$0xff] %vm1114_vm1, %v1112_v6 }
 0x1ac PF: > { %s15_s18 = sadd.s32 1, %s1635_s18  }
 0x1ad   : > { %p12_p4 = scmp.ge.s32.totalorder %s15_s18, 4  }
 0x1af   :  { %14 = sbr.rel (!%p12_p4) target bundleno = 1 (0x1), region = 73 }

</bundles_post_ra>
